<compile_context>
chip_gen: v7x
topology: tpu7x:2x2x1
jax: 0.10.0
libtpu: 0.0.40
codegen_flags: <defaults>
</compile_context>

<pallas_src>
import functools

import numpy as np

import jax
import jax.numpy as jnp
from jax import lax
from jax.experimental import pallas as pl
from jax.experimental.pallas import tpu as pltpu


def _sepconv_kernel(x_ref, mask_ref, dww_ref, dwb_ref, pw_ref, pwb_ref, o_ref,
                    *, taps, apply_act, matmul_dtype, depthwise_dtype):
    """One batch tile (Bt images), channels-on-sublanes, flat lane-dense spatial.

    x_ref    : (Cin,  Bt*HWp)   input, flat per-image spatial (padded to 128 lanes)
    mask_ref : (k*k,  Bt*HWp)   0/1 zero-padding masks per tap
    dww_ref  : (Cin,  k*k)      depthwise weights
    dwb_ref  : (Cin,  1)        depthwise bias
    pw_ref   : (Cout, Cin)      pointwise (1x1 conv) weights
    pwb_ref  : (Cout, 1)        pointwise bias
    o_ref    : (Cout, Bt*HWp)   output slab
    taps     : static tuple of (tap_index, lane_roll_shift, needs_mask)
    """
    cdt = depthwise_dtype
    x = x_ref[...].astype(cdt)                       # (Cin, L)
    dww = dww_ref[...].astype(cdt)                   # (Cin, k*k)

    # ---- depthwise conv: k*k lane rolls (XLU) + masked FMAs (VPU) ----
    acc = None
    for t, shift, needs_mask in taps:
        xr = pltpu.roll(x, shift=shift, axis=1) if shift else x
        if needs_mask:                               # zero out the padding ring
            xr = xr * mask_ref[t:t + 1, :]           # (1, L) broadcast
        term = xr * dww[:, t:t + 1]                  # per-channel weight (lane bcast)
        acc = term if acc is None else acc + term    # init from first tap (no zeros)

    acc = acc.astype(jnp.float32) + dwb_ref[...].astype(jnp.float32)  # (Cin, 1) bias

    # ---- activation (ReLU) ----
    if apply_act:
        acc = jnp.maximum(acc, 0.0)

    # ---- pointwise 1x1 conv: one MXU matmul, K = Cin, N = Bt*HWp lanes ----
    out = jnp.dot(pw_ref[...].astype(matmul_dtype),
                  acc.astype(matmul_dtype),
                  preferred_element_type=jnp.float32)                 # (Cout, L)
    out = out + pwb_ref[...].astype(jnp.float32)                      # (Cout, 1) bias
    o_ref[...] = out.astype(o_ref.dtype)             # one unmasked lane-dense store


def _vmem_limit_bytes():
    """Generation-aware VMEM limit: ~3/4 of physical VMEM (96 MiB on v5e/v6e, 48 MiB on v7x)."""
    try:
        cap = pltpu.get_tpu_info().vmem_capacity_bytes
    except Exception:
        cap = 64 * 1024 * 1024
    return int(min(cap * 3 // 4, 96 * 1024 * 1024))


def _pick_batch_tile(B, Cin, Cout, HWp, kk, budget_bytes, min_grid=2):
    """Largest batch tile whose per-step working set fits `budget_bytes`, preferring a
    grid of >= `min_grid` steps so the input DMA hides behind the previous step's compute.
    (On v7x, min_grid >= 4 also keeps both TensorCores busy via "parallel" sharding.)"""
    def per_step_bytes(bt):
        lanes = bt * HWp
        x_bytes = lanes * Cin * 4 * 4      # x block (2 pipeline bufs) + acc + rolled temp
        o_bytes = lanes * Cout * 4 * 2     # output block, double buffered
        m_bytes = lanes * kk * 4           # padding masks (constant index, ~single buffered)
        return x_bytes + o_bytes + m_bytes

    fits = [bt for bt in range(B, 0, -1) if B % bt == 0 and per_step_bytes(bt) <= budget_bytes]
    if not fits:
        # TODO(synk): for very large H*W even Bt=1 may exceed the budget — needs the
        # halo'd HW-tiling grid axis below; degrade gracefully rather than pick Bt=B.
        return 1
    for bt in fits:                        # descending: largest bt keeping >= min_grid steps
        if B // bt >= min_grid:
            return bt
    return fits[0]


def sep_conv2d(x, dw_weight, dw_bias, pw_weight, pw_bias,
               *, kernel_size, stride=1, padding=0, dilation=1,
               apply_act=True, matmul_dtype=jnp.bfloat16,
               depthwise_dtype=jnp.float32):
    """SepConv2d forward.  x: (B, Cin, H, W) NCHW (PyTorch convention).

    matmul_dtype   : MXU operand dtype for the pointwise dot (bf16 default, f32 acc).
    depthwise_dtype: elementwise dtype for the roll/FMA depthwise loop
                     (keep f32 on v5e; bf16 is profitable on v6e/v7x VALUs).
    """
    assert stride == 1  # TODO(synk): support stride>1 (strided lane selection of the depthwise output)
    B, Cin, H, W = x.shape
    Cout = pw_weight.shape[0]
    k, dil, pad = kernel_size, dilation, padding

    Ho = H + 2 * pad - dil * (k - 1)
    Wo = W + 2 * pad - dil * (k - 1)
    # TODO(synk): padding > dilation*(kernel_size-1)/2 would need an in-kernel padded scratch.
    assert 0 < Ho <= H and 0 < Wo <= W
    HW = H * W
    HWp = -(-HW // 128) * 128              # lane-pad flat spatial to a multiple of 128

    vmem_limit = _vmem_limit_bytes()
    Bt = _pick_batch_tile(B, Cin, Cout, HWp, k * k, int(vmem_limit * 0.6))
    L = Bt * HWp                           # lanes per grid step

    # Channels-on-sublanes, flat lane-dense spatial: (Cin, B*HWp).
    x_flat = x.reshape(B, Cin, HW)
    if HWp != HW:
        x_flat = jnp.pad(x_flat, ((0, 0), (0, 0), (0, HWp - HW)))
    x_cs = jnp.transpose(x_flat, (1, 0, 2)).reshape(Cin, B * HWp)

    # Static per-tap lane-roll shifts and 0/1 zero-padding masks over the HxW grid.
    # Rolls wrap across image boundaries / the lane-padding tail, but every wrapped
    # lane is exactly a masked-out (out-of-bounds) tap or a cropped padded lane.
    ii, jj = np.meshgrid(np.arange(H), np.arange(W), indexing="ij")
    taps = []
    masks = np.zeros((k * k, HWp), np.float32)
    for kh in range(k):
        for kw in range(k):
            t = kh * k + kw
            dh = kh * dil - pad
            dw_ = kw * dil - pad
            valid = ((ii + dh >= 0) & (ii + dh < H) &
                     (jj + dw_ >= 0) & (jj + dw_ < W))
            masks[t, :HW] = valid.reshape(HW)
            shift = int((-(dh * W + dw_)) % L)        # rolled[q] == x[q + dh*W + dw_]
            taps.append((t, shift, not bool(valid.all())))
    masks_t = jnp.asarray(np.tile(masks, (1, Bt))).astype(depthwise_dtype)   # (k*k, L)

    # 2-D lane/sublane-friendly parameters (no batch tiling, no kron block-diagonal).
    dww = dw_weight.reshape(Cin, k * k).astype(depthwise_dtype)              # (Cin, k*k)
    dwb = dw_bias.reshape(Cin, 1).astype(jnp.float32)                        # (Cin, 1)
    pww = pw_weight.reshape(Cout, Cin).astype(matmul_dtype)                  # (Cout, Cin)
    pwb = pw_bias.reshape(Cout, 1).astype(jnp.float32)                       # (Cout, 1)

    kern = functools.partial(_sepconv_kernel, taps=tuple(taps),
                             apply_act=apply_act, matmul_dtype=matmul_dtype,
                             depthwise_dtype=depthwise_dtype)

    def _build(single_buffer_params):
        pm = dict(pipeline_mode=pl.Buffered(1)) if single_buffer_params else {}
        return pl.pallas_call(
            kern,
            out_shape=jax.ShapeDtypeStruct((Cout, B * HWp), x.dtype),
            grid_spec=pltpu.PrefetchScalarGridSpec(
                num_scalar_prefetch=0,
                grid=(B // Bt,),
                in_specs=[
                    pl.BlockSpec((Cin, L), lambda g: (0, g)),
                    pl.BlockSpec((k * k, L), lambda g: (0, 0), **pm),
                    pl.BlockSpec((Cin, k * k), lambda g: (0, 0), **pm),
                    pl.BlockSpec((Cin, 1), lambda g: (0, 0), **pm),
                    pl.BlockSpec((Cout, Cin), lambda g: (0, 0), **pm),
                    pl.BlockSpec((Cout, 1), lambda g: (0, 0), **pm),
                ],
                out_specs=pl.BlockSpec((Cout, L), lambda g: (0, g)),
            ),
            compiler_params=pltpu.CompilerParams(
                dimension_semantics=("parallel",),
                vmem_limit_bytes=vmem_limit),
        )

    args = (x_cs, masks_t, dww, dwb, pww, pwb)
    try:
        # Constant-index parameter inputs single-buffered (frees VMEM for bigger tiles).
        out_flat = jax.block_until_ready(_build(True)(*args))
    except Exception:
        # pipeline_mode=pl.Buffered(1) unsupported in this Pallas build -> default buffering.
        out_flat = _build(False)(*args)

    # Lane-dense slab -> NCHW; drop lane padding, crop to the valid window.
    out = jnp.transpose(out_flat.reshape(Cout, B, HWp), (1, 0, 2))[:, :, :HW]
    out = out.reshape(B, Cout, H, W)
    if Ho != H or Wo != W:
        out = out[:, :, :Ho, :Wo]
    # TODO(synk): for very large H*W, add a second "parallel" grid axis tiling the flat
    # spatial axis with a (k-1)*dilation*W-lane halo to bound per-step VMEM on v7x.
    return out


def _reference(x, dw_weight, dw_bias, pw_weight, pw_bias,
               *, kernel_size, stride, padding, dilation):
    Cin = x.shape[1]
    Cout = pw_weight.shape[0]
    dw = lax.conv_general_dilated(
        x, dw_weight, window_strides=(stride, stride),
        padding=[(padding, padding), (padding, padding)],
        rhs_dilation=(dilation, dilation),
        dimension_numbers=("NCHW", "OIHW", "NCHW"),
        feature_group_count=Cin)
    dw = dw + dw_bias.reshape(1, Cin, 1, 1)
    dw = jnp.maximum(dw, 0.0)
    pw = lax.conv_general_dilated(
        dw, pw_weight, window_strides=(1, 1), padding="VALID",
        dimension_numbers=("NCHW", "OIHW", "NCHW"))
    return pw + pw_bias.reshape(1, Cout, 1, 1)


if __name__ == "__main__":
    # Module config (synthetic, deterministic init — no checkpoint load).
    B, Cin, Cout, H, W = 2, 4, 8, 16, 16
    kernel_size, stride, padding, dilation = 3, 1, 1, 1

    key = jax.random.PRNGKey(0)
    k_x, k_dw, k_dwb, k_pw, k_pwb = jax.random.split(key, 5)

    x = jax.random.normal(k_x, (B, Cin, H, W), jnp.float32)
    # PyTorch parameter shapes: depthwise (Cin, 1, k, k) + (Cin,), pointwise (Cout, Cin, 1, 1) + (Cout,)
    dw_weight = jax.random.normal(k_dw, (Cin, 1, kernel_size, kernel_size), jnp.float32) * 0.2
    dw_bias = jax.random.normal(k_dwb, (Cin,), jnp.float32) * 0.1
    pw_weight = jax.random.normal(k_pw, (Cout, Cin, 1, 1), jnp.float32) * 0.2
    pw_bias = jax.random.normal(k_pwb, (Cout,), jnp.float32) * 0.1

    out = sep_conv2d(x, dw_weight, dw_bias, pw_weight, pw_bias,
                     kernel_size=kernel_size, stride=stride,
                     padding=padding, dilation=dilation)
    out = jax.block_until_ready(out)

    ref = _reference(x, dw_weight, dw_bias, pw_weight, pw_bias,
                     kernel_size=kernel_size, stride=stride,
                     padding=padding, dilation=dilation)
    assert out.shape == (B, Cout, H, W), out.shape
    err = float(jnp.max(jnp.abs(out - ref)))
    # bf16 MXU operands (f32 accumulate) -> relaxed tolerance vs the f32 reference.
    assert jnp.allclose(out, ref, atol=3e-2, rtol=3e-2), err

    print("KERNEL_OK")
</pallas_src>

<mosaic_0001>
module attributes {stable_mosaic.version = 11 : i64} {
  func.func @_sepconv_kernel(%arg0: i32, %arg1: memref<4x256xf32, #tpu.memory_space<vmem>>, %arg2: memref<9x256xf32, #tpu.memory_space<vmem>>, %arg3: memref<4x9xf32, #tpu.memory_space<vmem>>, %arg4: memref<4x1xf32, #tpu.memory_space<vmem>>, %arg5: memref<8x4xbf16, #tpu.memory_space<vmem>>, %arg6: memref<8x1xf32, #tpu.memory_space<vmem>>, %arg7: memref<8x256xf32, #tpu.memory_space<vmem>>) attributes {dimension_semantics = [#tpu.dimension_semantics<parallel>], iteration_bounds = array<i64: 2>, scalar_prefetch = 0 : i64, scratch_operands = 0 : i64, tpu.core_type = #tpu.core_type<tc>, window_params = [{transform_indices = @transform_0, window_bounds = array<i64: 4, 256>}, {pipeline_mode = #tpu.pipeline_mode<synchronous>, transform_indices = @transform_1, window_bounds = array<i64: 9, 256>}, {pipeline_mode = #tpu.pipeline_mode<synchronous>, transform_indices = @transform_2, window_bounds = array<i64: 4, 9>}, {pipeline_mode = #tpu.pipeline_mode<synchronous>, transform_indices = @transform_3, window_bounds = array<i64: 4, 1>}, {pipeline_mode = #tpu.pipeline_mode<synchronous>, transform_indices = @transform_4, window_bounds = array<i64: 8, 4>}, {pipeline_mode = #tpu.pipeline_mode<synchronous>, transform_indices = @transform_5, window_bounds = array<i64: 8, 1>}, {transform_indices = @transform_6, window_bounds = array<i64: 8, 256>}]} {
    %c0 = arith.constant 0 : index
    %c0_0 = arith.constant 0 : index
    %0 = vector.load %arg1[%c0, %c0_0] : memref<4x256xf32, #tpu.memory_space<vmem>>, vector<4x256xf32>
    %c0_1 = arith.constant 0 : index
    %c0_2 = arith.constant 0 : index
    %1 = vector.load %arg3[%c0_1, %c0_2] : memref<4x9xf32, #tpu.memory_space<vmem>>, vector<4x9xf32>
    %c17_i32 = arith.constant 17 : i32
    %2 = tpu.dynamic_rotate %0 by %c17_i32 dim 1 : vector<4x256xf32>, i32 -> vector<4x256xf32>
    %c0_3 = arith.constant 0 : index
    %c0_4 = arith.constant 0 : index
    %3 = vector.load %arg2[%c0_3, %c0_4] : memref<9x256xf32, #tpu.memory_space<vmem>>, vector<1x256xf32>
    %4 = vector.broadcast %3 : vector<1x256xf32> to vector<4x256xf32>
    %5 = arith.mulf %2, %4 : vector<4x256xf32>
    %6 = vector.extract_strided_slice %1 {offsets = [0, 0], sizes = [4, 1], strides = [1, 1]} : vector<4x9xf32> to vector<4x1xf32>
    %7 = vector.broadcast %6 : vector<4x1xf32> to vector<4x256xf32>
    %8 = arith.mulf %5, %7 : vector<4x256xf32>
    %c16_i32 = arith.constant 16 : i32
    %9 = tpu.dynamic_rotate %0 by %c16_i32 dim 1 : vector<4x256xf32>, i32 -> vector<4x256xf32>
    %c1 = arith.constant 1 : index
    %c0_5 = arith.constant 0 : index
    %10 = vector.load %arg2[%c1, %c0_5] : memref<9x256xf32, #tpu.memory_space<vmem>>, vector<1x256xf32>
    %11 = vector.broadcast %10 : vector<1x256xf32> to vector<4x256xf32>
    %12 = arith.mulf %9, %11 : vector<4x256xf32>
    %13 = vector.extract_strided_slice %1 {offsets = [0, 1], sizes = [4, 1], strides = [1, 1]} : vector<4x9xf32> to vector<4x1xf32>
    %14 = vector.broadcast %13 : vector<4x1xf32> to vector<4x256xf32>
    %15 = arith.mulf %12, %14 : vector<4x256xf32>
    %16 = arith.addf %8, %15 : vector<4x256xf32>
    %c15_i32 = arith.constant 15 : i32
    %17 = tpu.dynamic_rotate %0 by %c15_i32 dim 1 : vector<4x256xf32>, i32 -> vector<4x256xf32>
    %c2 = arith.constant 2 : index
    %c0_6 = arith.constant 0 : index
    %18 = vector.load %arg2[%c2, %c0_6] : memref<9x256xf32, #tpu.memory_space<vmem>>, vector<1x256xf32>
    %19 = vector.broadcast %18 : vector<1x256xf32> to vector<4x256xf32>
    %20 = arith.mulf %17, %19 : vector<4x256xf32>
    %21 = vector.extract_strided_slice %1 {offsets = [0, 2], sizes = [4, 1], strides = [1, 1]} : vector<4x9xf32> to vector<4x1xf32>
    %22 = vector.broadcast %21 : vector<4x1xf32> to vector<4x256xf32>
    %23 = arith.mulf %20, %22 : vector<4x256xf32>
    %24 = arith.addf %16, %23 : vector<4x256xf32>
    %c1_i32 = arith.constant 1 : i32
    %25 = tpu.dynamic_rotate %0 by %c1_i32 dim 1 : vector<4x256xf32>, i32 -> vector<4x256xf32>
    %c3 = arith.constant 3 : index
    %c0_7 = arith.constant 0 : index
    %26 = vector.load %arg2[%c3, %c0_7] : memref<9x256xf32, #tpu.memory_space<vmem>>, vector<1x256xf32>
    %27 = vector.broadcast %26 : vector<1x256xf32> to vector<4x256xf32>
    %28 = arith.mulf %25, %27 : vector<4x256xf32>
    %29 = vector.extract_strided_slice %1 {offsets = [0, 3], sizes = [4, 1], strides = [1, 1]} : vector<4x9xf32> to vector<4x1xf32>
    %30 = vector.broadcast %29 : vector<4x1xf32> to vector<4x256xf32>
    %31 = arith.mulf %28, %30 : vector<4x256xf32>
    %32 = arith.addf %24, %31 : vector<4x256xf32>
    %33 = vector.extract_strided_slice %1 {offsets = [0, 4], sizes = [4, 1], strides = [1, 1]} : vector<4x9xf32> to vector<4x1xf32>
    %34 = vector.broadcast %33 : vector<4x1xf32> to vector<4x256xf32>
    %35 = arith.mulf %0, %34 : vector<4x256xf32>
    %36 = arith.addf %32, %35 : vector<4x256xf32>
    %c255_i32 = arith.constant 255 : i32
    %37 = tpu.dynamic_rotate %0 by %c255_i32 dim 1 : vector<4x256xf32>, i32 -> vector<4x256xf32>
    %c5 = arith.constant 5 : index
    %c0_8 = arith.constant 0 : index
    %38 = vector.load %arg2[%c5, %c0_8] : memref<9x256xf32, #tpu.memory_space<vmem>>, vector<1x256xf32>
    %39 = vector.broadcast %38 : vector<1x256xf32> to vector<4x256xf32>
    %40 = arith.mulf %37, %39 : vector<4x256xf32>
    %41 = vector.extract_strided_slice %1 {offsets = [0, 5], sizes = [4, 1], strides = [1, 1]} : vector<4x9xf32> to vector<4x1xf32>
    %42 = vector.broadcast %41 : vector<4x1xf32> to vector<4x256xf32>
    %43 = arith.mulf %40, %42 : vector<4x256xf32>
    %44 = arith.addf %36, %43 : vector<4x256xf32>
    %c241_i32 = arith.constant 241 : i32
    %45 = tpu.dynamic_rotate %0 by %c241_i32 dim 1 : vector<4x256xf32>, i32 -> vector<4x256xf32>
    %c6 = arith.constant 6 : index
    %c0_9 = arith.constant 0 : index
    %46 = vector.load %arg2[%c6, %c0_9] : memref<9x256xf32, #tpu.memory_space<vmem>>, vector<1x256xf32>
    %47 = vector.broadcast %46 : vector<1x256xf32> to vector<4x256xf32>
    %48 = arith.mulf %45, %47 : vector<4x256xf32>
    %49 = vector.extract_strided_slice %1 {offsets = [0, 6], sizes = [4, 1], strides = [1, 1]} : vector<4x9xf32> to vector<4x1xf32>
    %50 = vector.broadcast %49 : vector<4x1xf32> to vector<4x256xf32>
    %51 = arith.mulf %48, %50 : vector<4x256xf32>
    %52 = arith.addf %44, %51 : vector<4x256xf32>
    %c240_i32 = arith.constant 240 : i32
    %53 = tpu.dynamic_rotate %0 by %c240_i32 dim 1 : vector<4x256xf32>, i32 -> vector<4x256xf32>
    %c7 = arith.constant 7 : index
    %c0_10 = arith.constant 0 : index
    %54 = vector.load %arg2[%c7, %c0_10] : memref<9x256xf32, #tpu.memory_space<vmem>>, vector<1x256xf32>
    %55 = vector.broadcast %54 : vector<1x256xf32> to vector<4x256xf32>
    %56 = arith.mulf %53, %55 : vector<4x256xf32>
    %57 = vector.extract_strided_slice %1 {offsets = [0, 7], sizes = [4, 1], strides = [1, 1]} : vector<4x9xf32> to vector<4x1xf32>
    %58 = vector.broadcast %57 : vector<4x1xf32> to vector<4x256xf32>
    %59 = arith.mulf %56, %58 : vector<4x256xf32>
    %60 = arith.addf %52, %59 : vector<4x256xf32>
    %c239_i32 = arith.constant 239 : i32
    %61 = tpu.dynamic_rotate %0 by %c239_i32 dim 1 : vector<4x256xf32>, i32 -> vector<4x256xf32>
    %c8 = arith.constant 8 : index
    %c0_11 = arith.constant 0 : index
    %62 = vector.load %arg2[%c8, %c0_11] : memref<9x256xf32, #tpu.memory_space<vmem>>, vector<1x256xf32>
    %63 = vector.broadcast %62 : vector<1x256xf32> to vector<4x256xf32>
    %64 = arith.mulf %61, %63 : vector<4x256xf32>
    %65 = vector.extract_strided_slice %1 {offsets = [0, 8], sizes = [4, 1], strides = [1, 1]} : vector<4x9xf32> to vector<4x1xf32>
    %66 = vector.broadcast %65 : vector<4x1xf32> to vector<4x256xf32>
    %67 = arith.mulf %64, %66 : vector<4x256xf32>
    %68 = arith.addf %60, %67 : vector<4x256xf32>
    %c0_12 = arith.constant 0 : index
    %c0_13 = arith.constant 0 : index
    %69 = vector.load %arg4[%c0_12, %c0_13] : memref<4x1xf32, #tpu.memory_space<vmem>>, vector<4x1xf32>
    %70 = vector.broadcast %69 : vector<4x1xf32> to vector<4x256xf32>
    %71 = arith.addf %68, %70 : vector<4x256xf32>
    %cst = arith.constant 0.000000e+00 : f32
    %72 = vector.broadcast %cst : f32 to vector<4x256xf32>
    %73 = arith.maximumf %71, %72 : vector<4x256xf32>
    %c0_14 = arith.constant 0 : index
    %c0_15 = arith.constant 0 : index
    %74 = vector.load %arg5[%c0_14, %c0_15] : memref<8x4xbf16, #tpu.memory_space<vmem>>, vector<8x4xbf16>
    %75 = arith.truncf %73 : vector<4x256xf32> to vector<4x256xbf16>
    %cst_16 = arith.constant dense<0.000000e+00> : vector<8x256xf32>
    %76 = tpu.matmul %74, %75, %cst_16 {dimension_numbers = #tpu.dot_dimension_numbers<[1], [0], [0], [1], [0, 0, 1, 1], [], []>} : vector<8x4xbf16>, vector<4x256xbf16>, vector<8x256xf32> -> vector<8x256xf32>
    %c0_17 = arith.constant 0 : index
    %c0_18 = arith.constant 0 : index
    %77 = vector.load %arg6[%c0_17, %c0_18] : memref<8x1xf32, #tpu.memory_space<vmem>>, vector<8x1xf32>
    %78 = vector.broadcast %77 : vector<8x1xf32> to vector<8x256xf32>
    %79 = arith.addf %76, %78 : vector<8x256xf32>
    %c0_19 = arith.constant 0 : index
    %c0_20 = arith.constant 0 : index
    %80 = vector.load %arg7[%c0_19, %c0_20] : memref<8x256xf32, #tpu.memory_space<vmem>>, vector<8x256xf32>
    tpu.vector_store %arg7[%c0_19, %c0_20], %79 {strides = array<i32>} : memref<8x256xf32, #tpu.memory_space<vmem>>, vector<8x256xf32>,
    return
  }
  func.func @transform_0(%arg0: i32) -> (i32, i32) {
    %c0_i32 = arith.constant 0 : i32
    %c0_i32_0 = arith.constant 0 : i32
    return %c0_i32, %arg0 : i32, i32
  }
  func.func @transform_1(%arg0: i32) -> (i32, i32) {
    %c0_i32 = arith.constant 0 : i32
    %c0_i32_0 = arith.constant 0 : i32
    %c0_i32_1 = arith.constant 0 : i32
    return %c0_i32, %c0_i32_0 : i32, i32
  }
  func.func @transform_2(%arg0: i32) -> (i32, i32) {
    %c0_i32 = arith.constant 0 : i32
    %c0_i32_0 = arith.constant 0 : i32
    %c0_i32_1 = arith.constant 0 : i32
    return %c0_i32, %c0_i32_0 : i32, i32
  }
  func.func @transform_3(%arg0: i32) -> (i32, i32) {
    %c0_i32 = arith.constant 0 : i32
    %c0_i32_0 = arith.constant 0 : i32
    %c0_i32_1 = arith.constant 0 : i32
    return %c0_i32, %c0_i32_0 : i32, i32
  }
  func.func @transform_4(%arg0: i32) -> (i32, i32) {
    %c0_i32 = arith.constant 0 : i32
    %c0_i32_0 = arith.constant 0 : i32
    %c0_i32_1 = arith.constant 0 : i32
    return %c0_i32, %c0_i32_0 : i32, i32
  }
  func.func @transform_5(%arg0: i32) -> (i32, i32) {
    %c0_i32 = arith.constant 0 : i32
    %c0_i32_0 = arith.constant 0 : i32
    %c0_i32_1 = arith.constant 0 : i32
    return %c0_i32, %c0_i32_0 : i32, i32
  }
  func.func @transform_6(%arg0: i32) -> (i32, i32) {
    %c0_i32 = arith.constant 0 : i32
    %c0_i32_0 = arith.constant 0 : i32
    return %c0_i32, %arg0 : i32, i32
  }
}

module attributes {stable_mosaic.version = 11 : i64} {
  func.func @_sepconv_kernel(%arg0: i32, %arg1: memref<4x256xf32, #tpu.memory_space<vmem>>, %arg2: memref<9x256xf32, #tpu.memory_space<vmem>>, %arg3: memref<4x9xf32, #tpu.memory_space<vmem>>, %arg4: memref<4x1xf32, #tpu.memory_space<vmem>>, %arg5: memref<8x4xbf16, #tpu.memory_space<vmem>>, %arg6: memref<8x1xf32, #tpu.memory_space<vmem>>, %arg7: memref<8x256xf32, #tpu.memory_space<vmem>>) attributes {dimension_semantics = [#tpu.dimension_semantics<parallel>], iteration_bounds = array<i64: 2>, scalar_prefetch = 0 : i64, scratch_operands = 0 : i64, tpu.core_type = #tpu.core_type<tc>, window_params = [{transform_indices = @transform_0, window_bounds = array<i64: 4, 256>}, {pipeline_mode = #tpu.pipeline_mode<synchronous>, transform_indices = @transform_1, window_bounds = array<i64: 9, 256>}, {pipeline_mode = #tpu.pipeline_mode<synchronous>, transform_indices = @transform_2, window_bounds = array<i64: 4, 9>}, {pipeline_mode = #tpu.pipeline_mode<synchronous>, transform_indices = @transform_3, window_bounds = array<i64: 4, 1>}, {pipeline_mode = #tpu.pipeline_mode<synchronous>, transform_indices = @transform_4, window_bounds = array<i64: 8, 4>}, {pipeline_mode = #tpu.pipeline_mode<synchronous>, transform_indices = @transform_5, window_bounds = array<i64: 8, 1>}, {transform_indices = @transform_6, window_bounds = array<i64: 8, 256>}]} {
    %c0 = arith.constant 0 : index
    %c0_0 = arith.constant 0 : index
    %0 = vector.load %arg1[%c0, %c0_0] : memref<4x256xf32, #tpu.memory_space<vmem>>, vector<4x256xf32>
    %c0_1 = arith.constant 0 : index
    %c0_2 = arith.constant 0 : index
    %1 = vector.load %arg3[%c0_1, %c0_2] : memref<4x9xf32, #tpu.memory_space<vmem>>, vector<4x9xf32>
    %c17_i32 = arith.constant 17 : i32
    %2 = tpu.dynamic_rotate %0 by %c17_i32 dim 1 : vector<4x256xf32>, i32 -> vector<4x256xf32>
    %c0_3 = arith.constant 0 : index
    %c0_4 = arith.constant 0 : index
    %3 = vector.load %arg2[%c0_3, %c0_4] : memref<9x256xf32, #tpu.memory_space<vmem>>, vector<1x256xf32>
    %4 = vector.broadcast %3 : vector<1x256xf32> to vector<4x256xf32>
    %5 = arith.mulf %2, %4 : vector<4x256xf32>
    %6 = vector.extract_strided_slice %1 {offsets = [0, 0], sizes = [4, 1], strides = [1, 1]} : vector<4x9xf32> to vector<4x1xf32>
    %7 = vector.broadcast %6 : vector<4x1xf32> to vector<4x256xf32>
    %8 = arith.mulf %5, %7 : vector<4x256xf32>
    %c16_i32 = arith.constant 16 : i32
    %9 = tpu.dynamic_rotate %0 by %c16_i32 dim 1 : vector<4x256xf32>, i32 -> vector<4x256xf32>
    %c1 = arith.constant 1 : index
    %c0_5 = arith.constant 0 : index
    %10 = vector.load %arg2[%c1, %c0_5] : memref<9x256xf32, #tpu.memory_space<vmem>>, vector<1x256xf32>
    %11 = vector.broadcast %10 : vector<1x256xf32> to vector<4x256xf32>
    %12 = arith.mulf %9, %11 : vector<4x256xf32>
    %13 = vector.extract_strided_slice %1 {offsets = [0, 1], sizes = [4, 1], strides = [1, 1]} : vector<4x9xf32> to vector<4x1xf32>
    %14 = vector.broadcast %13 : vector<4x1xf32> to vector<4x256xf32>
    %15 = arith.mulf %12, %14 : vector<4x256xf32>
    %16 = arith.addf %8, %15 : vector<4x256xf32>
    %c15_i32 = arith.constant 15 : i32
    %17 = tpu.dynamic_rotate %0 by %c15_i32 dim 1 : vector<4x256xf32>, i32 -> vector<4x256xf32>
    %c2 = arith.constant 2 : index
    %c0_6 = arith.constant 0 : index
    %18 = vector.load %arg2[%c2, %c0_6] : memref<9x256xf32, #tpu.memory_space<vmem>>, vector<1x256xf32>
    %19 = vector.broadcast %18 : vector<1x256xf32> to vector<4x256xf32>
    %20 = arith.mulf %17, %19 : vector<4x256xf32>
    %21 = vector.extract_strided_slice %1 {offsets = [0, 2], sizes = [4, 1], strides = [1, 1]} : vector<4x9xf32> to vector<4x1xf32>
    %22 = vector.broadcast %21 : vector<4x1xf32> to vector<4x256xf32>
    %23 = arith.mulf %20, %22 : vector<4x256xf32>
    %24 = arith.addf %16, %23 : vector<4x256xf32>
    %c1_i32 = arith.constant 1 : i32
    %25 = tpu.dynamic_rotate %0 by %c1_i32 dim 1 : vector<4x256xf32>, i32 -> vector<4x256xf32>
    %c3 = arith.constant 3 : index
    %c0_7 = arith.constant 0 : index
    %26 = vector.load %arg2[%c3, %c0_7] : memref<9x256xf32, #tpu.memory_space<vmem>>, vector<1x256xf32>
    %27 = vector.broadcast %26 : vector<1x256xf32> to vector<4x256xf32>
    %28 = arith.mulf %25, %27 : vector<4x256xf32>
    %29 = vector.extract_strided_slice %1 {offsets = [0, 3], sizes = [4, 1], strides = [1, 1]} : vector<4x9xf32> to vector<4x1xf32>
    %30 = vector.broadcast %29 : vector<4x1xf32> to vector<4x256xf32>
    %31 = arith.mulf %28, %30 : vector<4x256xf32>
    %32 = arith.addf %24, %31 : vector<4x256xf32>
    %33 = vector.extract_strided_slice %1 {offsets = [0, 4], sizes = [4, 1], strides = [1, 1]} : vector<4x9xf32> to vector<4x1xf32>
    %34 = vector.broadcast %33 : vector<4x1xf32> to vector<4x256xf32>
    %35 = arith.mulf %0, %34 : vector<4x256xf32>
    %36 = arith.addf %32, %35 : vector<4x256xf32>
    %c255_i32 = arith.constant 255 : i32
    %37 = tpu.dynamic_rotate %0 by %c255_i32 dim 1 : vector<4x256xf32>, i32 -> vector<4x256xf32>
    %c5 = arith.constant 5 : index
    %c0_8 = arith.constant 0 : index
    %38 = vector.load %arg2[%c5, %c0_8] : memref<9x256xf32, #tpu.memory_space<vmem>>, vector<1x256xf32>
    %39 = vector.broadcast %38 : vector<1x256xf32> to vector<4x256xf32>
    %40 = arith.mulf %37, %39 : vector<4x256xf32>
    %41 = vector.extract_strided_slice %1 {offsets = [0, 5], sizes = [4, 1], strides = [1, 1]} : vector<4x9xf32> to vector<4x1xf32>
    %42 = vector.broadcast %41 : vector<4x1xf32> to vector<4x256xf32>
    %43 = arith.mulf %40, %42 : vector<4x256xf32>
    %44 = arith.addf %36, %43 : vector<4x256xf32>
    %c241_i32 = arith.constant 241 : i32
    %45 = tpu.dynamic_rotate %0 by %c241_i32 dim 1 : vector<4x256xf32>, i32 -> vector<4x256xf32>
    %c6 = arith.constant 6 : index
    %c0_9 = arith.constant 0 : index
    %46 = vector.load %arg2[%c6, %c0_9] : memref<9x256xf32, #tpu.memory_space<vmem>>, vector<1x256xf32>
    %47 = vector.broadcast %46 : vector<1x256xf32> to vector<4x256xf32>
    %48 = arith.mulf %45, %47 : vector<4x256xf32>
    %49 = vector.extract_strided_slice %1 {offsets = [0, 6], sizes = [4, 1], strides = [1, 1]} : vector<4x9xf32> to vector<4x1xf32>
    %50 = vector.broadcast %49 : vector<4x1xf32> to vector<4x256xf32>
    %51 = arith.mulf %48, %50 : vector<4x256xf32>
    %52 = arith.addf %44, %51 : vector<4x256xf32>
    %c240_i32 = arith.constant 240 : i32
    %53 = tpu.dynamic_rotate %0 by %c240_i32 dim 1 : vector<4x256xf32>, i32 -> vector<4x256xf32>
    %c7 = arith.constant 7 : index
    %c0_10 = arith.constant 0 : index
    %54 = vector.load %arg2[%c7, %c0_10] : memref<9x256xf32, #tpu.memory_space<vmem>>, vector<1x256xf32>
    %55 = vector.broadcast %54 : vector<1x256xf32> to vector<4x256xf32>
    %56 = arith.mulf %53, %55 : vector<4x256xf32>
    %57 = vector.extract_strided_slice %1 {offsets = [0, 7], sizes = [4, 1], strides = [1, 1]} : vector<4x9xf32> to vector<4x1xf32>
    %58 = vector.broadcast %57 : vector<4x1xf32> to vector<4x256xf32>
    %59 = arith.mulf %56, %58 : vector<4x256xf32>
    %60 = arith.addf %52, %59 : vector<4x256xf32>
    %c239_i32 = arith.constant 239 : i32
    %61 = tpu.dynamic_rotate %0 by %c239_i32 dim 1 : vector<4x256xf32>, i32 -> vector<4x256xf32>
    %c8 = arith.constant 8 : index
    %c0_11 = arith.constant 0 : index
    %62 = vector.load %arg2[%c8, %c0_11] : memref<9x256xf32, #tpu.memory_space<vmem>>, vector<1x256xf32>
    %63 = vector.broadcast %62 : vector<1x256xf32> to vector<4x256xf32>
    %64 = arith.mulf %61, %63 : vector<4x256xf32>
    %65 = vector.extract_strided_slice %1 {offsets = [0, 8], sizes = [4, 1], strides = [1, 1]} : vector<4x9xf32> to vector<4x1xf32>
    %66 = vector.broadcast %65 : vector<4x1xf32> to vector<4x256xf32>
    %67 = arith.mulf %64, %66 : vector<4x256xf32>
    %68 = arith.addf %60, %67 : vector<4x256xf32>
    %c0_12 = arith.constant 0 : index
    %c0_13 = arith.constant 0 : index
    %69 = vector.load %arg4[%c0_12, %c0_13] : memref<4x1xf32, #tpu.memory_space<vmem>>, vector<4x1xf32>
    %70 = vector.broadcast %69 : vector<4x1xf32> to vector<4x256xf32>
    %71 = arith.addf %68, %70 : vector<4x256xf32>
    %cst = arith.constant 0.000000e+00 : f32
    %72 = vector.broadcast %cst : f32 to vector<4x256xf32>
    %73 = arith.maximumf %71, %72 : vector<4x256xf32>
    %c0_14 = arith.constant 0 : index
    %c0_15 = arith.constant 0 : index
    %74 = vector.load %arg5[%c0_14, %c0_15] : memref<8x4xbf16, #tpu.memory_space<vmem>>, vector<8x4xbf16>
    %75 = arith.truncf %73 : vector<4x256xf32> to vector<4x256xbf16>
    %cst_16 = arith.constant dense<0.000000e+00> : vector<8x256xf32>
    %76 = tpu.matmul %74, %75, %cst_16 {dimension_numbers = #tpu.dot_dimension_numbers<[1], [0], [0], [1], [0, 0, 1, 1], [], []>} : vector<8x4xbf16>, vector<4x256xbf16>, vector<8x256xf32> -> vector<8x256xf32>
    %c0_17 = arith.constant 0 : index
    %c0_18 = arith.constant 0 : index
    %77 = vector.load %arg6[%c0_17, %c0_18] : memref<8x1xf32, #tpu.memory_space<vmem>>, vector<8x1xf32>
    %78 = vector.broadcast %77 : vector<8x1xf32> to vector<8x256xf32>
    %79 = arith.addf %76, %78 : vector<8x256xf32>
    %c0_19 = arith.constant 0 : index
    %c0_20 = arith.constant 0 : index
    %80 = vector.load %arg7[%c0_19, %c0_20] : memref<8x256xf32, #tpu.memory_space<vmem>>, vector<8x256xf32>
    tpu.vector_store %arg7[%c0_19, %c0_20], %79 {strides = array<i32>} : memref<8x256xf32, #tpu.memory_space<vmem>>, vector<8x256xf32>,
    return
  }
  func.func @transform_0(%arg0: i32) -> (i32, i32) {
    %c0_i32 = arith.constant 0 : i32
    %c0_i32_0 = arith.constant 0 : i32
    return %c0_i32, %arg0 : i32, i32
  }
  func.func @transform_1(%arg0: i32) -> (i32, i32) {
    %c0_i32 = arith.constant 0 : i32
    %c0_i32_0 = arith.constant 0 : i32
    %c0_i32_1 = arith.constant 0 : i32
    return %c0_i32, %c0_i32_0 : i32, i32
  }
  func.func @transform_2(%arg0: i32) -> (i32, i32) {
    %c0_i32 = arith.constant 0 : i32
    %c0_i32_0 = arith.constant 0 : i32
    %c0_i32_1 = arith.constant 0 : i32
    return %c0_i32, %c0_i32_0 : i32, i32
  }
  func.func @transform_3(%arg0: i32) -> (i32, i32) {
    %c0_i32 = arith.constant 0 : i32
    %c0_i32_0 = arith.constant 0 : i32
    %c0_i32_1 = arith.constant 0 : i32
    return %c0_i32, %c0_i32_0 : i32, i32
  }
  func.func @transform_4(%arg0: i32) -> (i32, i32) {
    %c0_i32 = arith.constant 0 : i32
    %c0_i32_0 = arith.constant 0 : i32
    %c0_i32_1 = arith.constant 0 : i32
    return %c0_i32, %c0_i32_0 : i32, i32
  }
  func.func @transform_5(%arg0: i32) -> (i32, i32) {
    %c0_i32 = arith.constant 0 : i32
    %c0_i32_0 = arith.constant 0 : i32
    %c0_i32_1 = arith.constant 0 : i32
    return %c0_i32, %c0_i32_0 : i32, i32
  }
  func.func @transform_6(%arg0: i32) -> (i32, i32) {
    %c0_i32 = arith.constant 0 : i32
    %c0_i32_0 = arith.constant 0 : i32
    return %c0_i32, %arg0 : i32, i32
  }
}

</mosaic_0001>

<bundles_post_ra>
// kernel: tpu_custom_call.1
= control target key start
LH: loop header
LB: loop body
LE: loop exit
PB: predicated region body
PF: predicated region fallthrough
CT: control target
= control target key end

     0   :  { %11 = vsyncpa [#allocation3], 0  ;;  %s1162_s0 = inlined_call_operand.vmem [shape: f32[4,512], index: 0, kind: input, shape index: {}]   ;;  %s1163_s1 = inlined_call_operand.hbm [shape: f32[9,256], index: 1, kind: input, shape index: {}]   ;;  %s1164_s2 = inlined_call_operand.vmem [shape: f32[4,9], index: 2, kind: input, shape index: {}]   ;;  %s1165_s3 = inlined_call_operand.vmem [shape: f32[4,1], index: 3, kind: input, shape index: {}]   ;;  %s1166_s4 = inlined_call_operand.vmem [shape: bf16[8,4], index: 4, kind: input, shape index: {}]   ;;  %s1167_s5 = inlined_call_operand.vmem [shape: f32[8,1], index: 5, kind: input, shape index: {}]   ;;  %s1168_s6 = inlined_call_operand.hbm [shape: f32[8,512], index: 6, kind: output, shape index: {}]  }
   0x1   :  { %12 = vsyncpa [#allocation4], 0 }
   0x2   :  { %14 = vsyncpa [#allocation4 + $0x1], 0  ;;  %s942_s21 = smov 0   ;;  %s944_s22 = smov 0  }
   0x3   :  { %s946_s23 = smov 0   ;;  %s948_s24 = smov 0  }
   0x4 LB: > { %s963_s25 = sadd.s32 4294967295, %s883_s24   ;;  %s690_s26 = sadd.s32 4294967294, %s883_s24   ;;  %s883_s24 = sphi %s948_s24, %s1184_s24   ;;  %s879_s23 = sphi %s946_s23, %s1183_s23   ;;  %s875_s22 = sphi %s944_s22, %s1182_s22   ;;  %s871_s21 = sphi %s942_s21, %s1181_s21  }
   0x5   : > { %s967_s27 = sadd.s32 1, %s883_s24   ;;  %s158_s28 = sadd.s32 1, %s879_s23 }
   0x6   : > { %s155_s29 = ssub.s32 %s883_s24, %s967_s27  ;;  %p168_p0 = scmp.ne.s32.totalorder %s879_s23, %s875_s22 }
   0x7   : > { %p156_p1 = scmp.eq.s32.totalorder %s155_s29, 0  ;;  %p169_p2 = scmp.eq.s32.totalorder %s963_s25, 1 }
   0x8   : > { %p174_p3 = scmp.ne.s32.totalorder %s875_s22, %s871_s21  ;;  %p175_p4 = scmp.eq.s32.totalorder %s690_s26, 1 }
   0x9   : > { %s978_s30 = scalar_select %p156_p1, %s879_s23, %s158_s28  }
   0xa   : > { %p980_p5 = por %p169_p2, %p168_p0  ;;  %p984_p6 = por %p175_p4, %p174_p3 }
   0xb   : > { %p691_p7 = scmp.ge.s32.totalorder %s883_s24, 1  ;;  %p182_p8 = scmp.lt.s32.totalorder %s883_s24, 3 }
   0xc   : > { %s1172_s7 = scalar_select %p980_p5, 1, 0 }
   0xd   : > { %s1173_s8 = scalar_select %p984_p6, 1, 0 }
   0xe   : > { %p1169_p9 = scmp.eq.s32.totalorder %s963_s25, 0  ;;  %p991_p10 = pnand %p691_p7, %p182_p8 }
   0xf   : > { %s885_s10 = smov [#allocation2]   ;;  %s789_s15 = scalar_lea.hbm %s1163_s1, 512 }
  0x10   : > { %s1174_s9 = scalar_select %p991_p10, 1, 0 }
  0x11   : > { %s194_s11 = sshll.u32 %s885_s10, 4  ;;  %p713_p11 = pneg %p991_p10  ;;  %s195_s11 = int_to_ptr.vmem [resolvable:$true] %s194_s11 }
  0x12   : > { %p790_p13 = scmp.ne.s32.totalorder %s1163_s1, %s789_s15  ;;  %p796_p3 = scmp.lt.u32.totalorder %s789_s15, %s1163_s1 }
  0x13   : > { %p999_p12 = pnand %p1169_p9, %p713_p11 }
  0x15   : > { %p791_p0 = pneg %p999_p12 }
  0x17   : > { %p792_p1 = pnand %p791_p0, %p790_p13 }
  0x19   : > { %p793_p2 = pneg %p792_p1 }
  0x1b   : > { %p798_p4 = pnand %p796_p3, %p793_p2 }
  0x1d   : > { %801 = shalt.err (!%p798_p4)
}
  0x1e   : > { %s802_s20 = scalar_lea.vmem %s195_s11, 512  ;;  %p810_p9 = scmp.lt.s32.totalorder %s195_s11, %s195_s11 }
  0x1f   : > { %p803_p7 = scmp.ne.s32.totalorder %s195_s11, %s802_s20  ;;  %p811_p6 = scmp.lt.s32.totalorder %s802_s20, %s802_s20 }
  0x21   : > { %p805_p8 = pnand %p803_p7, %p791_p0  ;;  %p812_p5 = por %p811_p6, %p810_p9 }
  0x23   : > { %p806_p11 = pneg %p805_p8 }
  0x25   : > { %p813_p10 = pnand %p812_p5, %p806_p11 }
  0x27   : > { %816 = shalt.err (!%p813_p10)
}
  0x28   : > { %s886_s26 = smov 256   ;;  %s887_s28 = smov 16  }
  0x29   : > { %716 = dma.hbm_to_vmem [thread:$0]  (!%p999_p12), %s1163_s1, 512, %s195_s11, [#allocation3], %s886_s26, %s886_s26, %s887_s28  }
  0x2a   : > { %p1176_p13 = scmp.ne.s32.totalorder %s1174_s9, 0 }
  0x2b   : > { %p1177_p1 = scmp.eq.s32.totalorder (!%p1176_p13), %s963_s25, 0 }
  0x2c   : > { %231 = sbr.rel (%p1176_p13) target bundleno = 481 (0x1e1), region = 44 }
  0x33   : > { %862 = dma.done.wait (%p1177_p1), [#allocation3], 512   ;;  %p1178_p0 = pmov %p1177_p1 }
  0x34   : > { %v888_v0 = vmov 2   ;;  %v889_v1 = vmov 0   ;;  %s697_s13 = sshll.u32 %s963_s25, 1  ;;  %v270_v2 = vld [vmem:[%s1164_s2] sm:$0xf]  ;;  %v890_v4 = vmov 4   ;;  %v278_v24 = vlaneseq }
  0x35   : > { %864 = vsyncadd (%p1178_p0), [#allocation3], 4294966784  ;;  %779 = vset.pattern.permute.xlu1 %v888_v0  ;;  %777 = vset.pattern.permute.xlu0 %v889_v1  ;;  %p262_p5 = scmp.lt.s32.totalorder %s697_s13, 3  ;;  %v891_v5 = vmov 1   ;;  %s892_s17 = smov 17   ;;  %v893_v7 = vmov 3  }
  0x36   : > { %593 = vmatprep.mubr.bf16.mxu0 %v889_v1  ;;  %357 = vperm.xlu1 %779, %v270_v2   ;;  %v894_v8 = vmov 5   ;;  %s895_s18 = smov 16   ;;  %s896_s19 = smov 15   ;;  %v898_v9 = vmov 6   ;;  %v900_v10 = vmov 8   ;;  %v902_v11 = vmov 7  }
  0x37   : > { %s1186_s13 = smov (!%p262_p5, %s697_s13), 3  ;;  %299 = vperm.xlu0 %777, %v270_v2   ;;  %s897_s20 = smov 1   ;;  %v531_v12 = vld [vmem:[%s1165_s3] sm:$0xf]  ;;  %v1058_v26 = vand.u32 127, %v278_v24  ;;  %v286_v27 = vshrl.u32 %v278_v24, 7 }
  0x38   : > { %s698_s12 = sshll.u32 %s1186_s13, 2  ;;  %s899_s26 = smov 127   ;;  %v544_v13 = vld [vmem:[%s1167_s5] sm:$0xff]  ;;  %v905_v30 = vmov 839922192   ;;  %vm554_vm8 = vcmask 1041408  }
  0x39   : > { %s265_s16 = scalar_lea.vmem %s1162_s0, %s698_s12  ;;  %s901_s28 = smov 113   ;;  %v398_v31 = vunpack.c.l.s4 %v905_v30  ;;  %v312_v32 = vld [vmem:[#allocation2 + $0x1] ss:$8 sm:$0x3]  ;;  %v1060_v33 = vsub.s32 0, %v286_v27  ;;  %v1062_v34 = vsub.s32 1, %v286_v27 }
  0x3a   : > { %v1032_v3 = vld [vmem:[%s265_s16] sm:$0xff]  ;;  %780 = vset.pattern.permute.xlu1 %v890_v4  ;;  %s903_s29 = smov 111   ;;  %s904_s12 = smov 112   ;;  %vm308_vm0 = vcmp.lt.s32.totalorder %v1058_v26, 16  ;;  %vm280_vm1 = vcmp.lt.s32.totalorder %v1058_v26, 17  ;;  %vm338_vm2 = vcmp.lt.s32.totalorder %v1058_v26, 15 }
  0x3b   : > { %778 = vset.pattern.permute.xlu0 %v891_v5  ;;  %395 = vperm.xlu1 %780, %v270_v2   ;;  %v272_v6 = vcombine.high %v1032_v3, %v1032_v3  ;;  %v283_v35 = vld [vmem:[#allocation2] ss:$8 sm:$0x3]  ;;  %v342_v36 = vld [vmem:[#allocation2 + $0x2] ss:$8 sm:$0x3]  ;;  %v317_v37 = vrot.slane %v312_v32, %v1060_v33  ;;  %v321_v38 = vrot.slane %v312_v32, %v1062_v34  ;;  %v399_v40 = vunpack.c.0.s8 %v398_v31 }
  0x3c   : > { %327 = vperm.xlu0 %778, %v270_v2   ;;  %v288_v43 = vrot.slane %v283_v35, %v1060_v33  ;;  %v292_v44 = vrot.slane %v283_v35, %v1062_v34  ;;  %v347_v45 = vrot.slane %v342_v36, %v1060_v33  ;;  %v372_v46 = vld [vmem:[#allocation2 + $0x3] ss:$8 sm:$0x3]  ;;  %v351_v50 = vrot.slane %v342_v36, %v1062_v34  ;;  %v419_v5 = vld [vmem:[#allocation2 + $0x5] ss:$8 sm:$0x3] }
  0x3d   : > { %vm368_vm3 = vcmp.lt.s32.totalorder %v1058_v26, 1  ;;  %v402_v56 = vsub.s32 %v399_v40, %v286_v27  ;;  %v377_v57 = vrot.slane %v372_v46, %v1060_v33  ;;  %v381_v58 = vrot.slane %v372_v46, %v1062_v34  ;;  %v479_v36 = vld [vmem:[#allocation2 + $0x7] ss:$8 sm:$0x3]  ;;  %s258_s16 = sand.u32 1, %s875_s22   ;;  %p1179_p9 = scmp.ne.s32.totalorder %s1172_s7, 0 }
  0x3e   : > { %vm415_vm4 = vcmp.lt.s32.totalorder %v1058_v26, 127  ;;  %vm445_vm5 = vcmp.lt.s32.totalorder %v1058_v26, 113  ;;  %vm475_vm6 = vcmp.lt.s32.totalorder %v1058_v26, 112  ;;  %v488_v46 = vrot.slane %v479_v36, %v1062_v34  ;;  %s906_s13 = smov [#allocation5]  }
  0x3f   : > { %274 = vrot.lane.b32.xlu1 %v1032_v3, %s892_s17  ;;  %vm505_vm7 = vcmp.lt.s32.totalorder %v1058_v26, 111  ;;  %vm550_vm9 = vcmask 31744  }
  0x40   : > { %276 = vrot.lane.b32.xlu0 %v272_v6, %s892_s17  ;;  %781 = vset.pattern.permute.xlu1 %v893_v7  ;;  %s696_s17 = sshll.u32 %s258_s16, 4 }
  0x41   : > { %782 = vset.pattern.permute.xlu0 %v894_v8 }
  0x43   : > { %304 = vrot.lane.b32.xlu1 %v1032_v3, %s895_s18 }
  0x44   : > { %306 = vrot.lane.b32.xlu0 %v272_v6, %s895_s18  ;;  %s706_s18 = sshll.u32 %s963_s25, 8  ;;  %s605_s25 = scalar_lea.sflag [#allocation4], %s258_s16 }
  0x47   : > { %387 = vperm.xlu1 %781, %v270_v2  }
  0x48   : > { %334 = vrot.lane.b32.xlu0 %v1032_v3, %s896_s19 }
  0x4b   : > { %336 = vrot.lane.b32.xlu1 %v272_v6, %s896_s19  ;;  %s260_s19 = scalar_lea.vmem [#allocation5], %s696_s17 }
  0x4c   : > { %364 = vrot.lane.b32.xlu0 %v1032_v3, %s897_s20  ;;  %783 = vset.pattern.permute.xlu1 %v898_v9 }
  0x4f   : > { %366 = vrot.lane.b32.xlu1 %v272_v6, %s897_s20  ;;  %s619_s20 = sshll.u32 %s260_s19, 4  ;;  %s1122_s20 = int_to_ptr.vmem [resolvable:$true] %s619_s20 }
  0x50   : > { %434 = vperm.xlu0 %782, %v270_v2   ;;  %s817_s10 = scalar_lea.vmem %s1122_s20, 256 }
  0x51   : > { %p818_p6 = scmp.ne.s32.totalorder %s1122_s20, %s817_s10 }
  0x53   : > { %464 = vperm.xlu1 %783, %v270_v2   ;;  %p819_p10 = pnand %p818_p6, %p1179_p9 }
  0x54   : > { %413 = vrot.lane.b32.xlu0 %v272_v6, %s899_s26 }
  0x55   : > { %785 = vset.pattern.permute.xlu0 %v900_v10  ;;  %p820_p12 = pneg %p819_p10 }
  0x57   : > { %411 = vrot.lane.b32.xlu1 %v1032_v3, %s899_s26 }
  0x58   : > { %441 = vrot.lane.b32.xlu0 %v1032_v3, %s901_s28  ;;  %784 = vset.pattern.permute.xlu1 %v902_v11 }
  0x5b   : > { %494 = vperm.xlu1 %784, %v270_v2  }
  0x5c   : > { %524 = vperm.xlu0 %785, %v270_v2  }
  0x5f   : > { %443 = vrot.lane.b32.xlu1 %v272_v6, %s901_s28 }
  0x60   : > { %501 = vrot.lane.b32.xlu0 %v1032_v3, %s903_s29  ;;  %787 = vset.pattern.permute.xlu1 %v889_v1 }
  0x61   : > { %786 = vset.pattern.permute.xlu0 %v889_v1 }
  0x63   : > { %471 = vrot.lane.b32.xlu1 %v1032_v3, %s904_s12 }
  0x64   : > { %534 = vperm.xlu0 %786, %v531_v12  }
  0x67   : > { %473 = vrot.lane.b32.xlu1 %v272_v6, %s904_s12  ;;  %s821_s12 = sshll.u32 %s906_s13, 4  ;;  %s822_s12 = int_to_ptr.vmem [resolvable:$false] %s821_s12 }
  0x68   : > { %s823_s11 = scalar_lea.vmem %s822_s12, 512  ;;  %p824_p2 = scmp.lt.s32.totalorder %s1122_s20, %s822_s12 }
  0x69   : > { %p825_p3 = scmp.lt.s32.totalorder %s823_s11, %s817_s10 }
  0x6b   : > { %503 = vrot.lane.b32.xlu1 %v272_v6, %s903_s29  ;;  %s1120_s29 = scalar_lea.hbm %s1168_s6, %s706_s18  ;;  %p826_p4 = por %p825_p3, %p824_p2 }
  0x6d   : > { %p827_p7 = pnand %p826_p4, %p820_p12 }
  0x6f   : > { %547 = vperm.xlu1 %787, %v544_v13  }
  0xb5   : > { %v1050_v14 = vpop.permute.xlu1 %357 }
  0xb6   : > { %v1052_v15 = vpop.permute.xlu0 %299 }
  0xba   : > { %v1054_v16 = vpop.permute.xlu1 %395 }
  0xbb   : > { %v328_v17 = vpop.permute.xlu0 %327  ;;  %v403_v9 = vrot.slane %v1054_v16, %v402_v56 }
  0xbd   : > { %v405_v27 = vmul.f32 %v403_v9, %v1032_v3 }
  0xbe   : > { %v275_v18 = vpop.permute.xlu1 %274 }
  0xbf   : > { %v277_v19 = vpop.permute.xlu0 %276 }
  0xc0   : > { %v281_v48 = vsel %vm280_vm1, %v275_v18, %v277_v19  ;;  %v282_v49 = vsel %vm280_vm1, %v277_v19, %v275_v18  ;;  %v424_v18 = vrot.slane %v419_v5, %v1060_v33 }
  0xc1   : > { %v295_v59 = vmul.f32 %v288_v43, %v282_v49  ;;  %v296_v60 = vmul.f32 %v292_v44, %v281_v48  ;;  %v407_v48 = vcombine.high %v405_v27, %v405_v27 }
  0xc2   : > { %v305_v20 = vpop.permute.xlu1 %304 }
  0xc3   : > { %v307_v21 = vpop.permute.xlu0 %306  ;;  %v302_v10 = vmul.f32 %v1052_v15, %v295_v59  ;;  %v303_v11 = vmul.f32 %v1052_v15, %v296_v60 }
  0xc4   : > { %v309_v41 = vsel %vm308_vm0, %v305_v20, %v307_v21  ;;  %v310_v42 = vsel %vm308_vm0, %v307_v21, %v305_v20  ;;  %v428_v21 = vrot.slane %v419_v5, %v1062_v34 }
  0xc5   : > { %v324_v51 = vmul.f32 %v317_v37, %v310_v42  ;;  %v325_v52 = vmul.f32 %v321_v38, %v309_v41 }
  0xc6   : > { %v1056_v22 = vpop.permute.xlu1 %387 }
  0xc7   : > { %v335_v23 = vpop.permute.xlu0 %334  ;;  %v330_v1 = vmul.f32 %v328_v17, %v324_v51  ;;  %v331_v2 = vmul.f32 %v328_v17, %v325_v52  ;;  %v449_v17 = vld [vmem:[#allocation2 + $0x6] ss:$8 sm:$0x3] }
  0xc9   : > { %v332_v19 = vadd.f32 %v330_v1, %v302_v10  ;;  %v333_v20 = vadd.f32 %v331_v2, %v303_v11 }
  0xca   : > { %v337_v25 = vpop.permute.xlu1 %336 }
  0xcb   : > { %v365_v28 = vpop.permute.xlu0 %364  ;;  %v339_v53 = vsel %vm338_vm2, %v335_v23, %v337_v25  ;;  %v340_v54 = vsel %vm338_vm2, %v337_v25, %v335_v23 }
  0xcc   : > { %v354_v63 = vmul.f32 %v347_v45, %v340_v54  ;;  %v355_v0 = vmul.f32 %v351_v50, %v339_v53  ;;  %v484_v45 = vrot.slane %v479_v36, %v1060_v33 }
  0xce   : > { %v367_v29 = vpop.permute.xlu1 %366  ;;  %v360_v12 = vmul.f32 %v1050_v14, %v354_v63  ;;  %v361_v13 = vmul.f32 %v1050_v14, %v355_v0  ;;  %v454_v14 = vrot.slane %v449_v17, %v1060_v33 }
  0xcf   : > { %v1074_v47 = vpop.permute.xlu0 %434  ;;  %v369_v61 = vsel %vm368_vm3, %v365_v28, %v367_v29  ;;  %v370_v62 = vsel %vm368_vm3, %v367_v29, %v365_v28  ;;  %v458_v29 = vrot.slane %v449_v17, %v1062_v34 }
  0xd0   : > { %v384_v7 = vmul.f32 %v377_v57, %v370_v62  ;;  %v385_v8 = vmul.f32 %v381_v58, %v369_v61  ;;  %v362_v30 = vadd.f32 %v360_v12, %v332_v19  ;;  %v363_v31 = vadd.f32 %v361_v13, %v333_v20 }
  0xd2   : > { %v1068_v39 = vpop.permute.xlu1 %464  ;;  %v390_v23 = vmul.f32 %v1056_v22, %v384_v7  ;;  %v391_v15 = vmul.f32 %v1056_v22, %v385_v8  ;;  %v509_v22 = vld [vmem:[#allocation2 + $0x10] ss:$8 sm:$0x3] }
  0xd3   : > { %v414_v4 = vpop.permute.xlu0 %413  ;;  %v514_v52 = vrot.slane %v509_v22, %v1060_v33  ;;  %v518_v53 = vrot.slane %v509_v22, %v1062_v34 }
  0xd4   : > { %v392_v41 = vadd.f32 %v390_v23, %v362_v30  ;;  %v393_v42 = vadd.f32 %v391_v15, %v363_v31  ;;  %v541_v23 = vld [vmem:[%s1166_s4] sm:$0xf] }
  0xd6   : > { %v412_v55 = vpop.permute.xlu1 %411  ;;  %v409_v54 = vadd.f32 %v405_v27, %v392_v41 }
  0xd7   : > { %v416_v24 = vsel %vm415_vm4, %v412_v55, %v414_v4  ;;  %v417_v25 = vsel %vm415_vm4, %v414_v4, %v412_v55  ;;  %v442_v28 = vpop.permute.xlu0 %441  ;;  %v410_v55 = vadd.f32 %v407_v48, %v393_v42 }
  0xd8   : > { %v431_v37 = vmul.f32 %v424_v18, %v416_v24  ;;  %v432_v38 = vmul.f32 %v428_v21, %v417_v25 }
  0xda   : > { %v495_v6 = vpop.permute.xlu1 %494  ;;  %v437_v49 = vmul.f32 %v1074_v47, %v431_v37  ;;  %v438_v50 = vmul.f32 %v1074_v47, %v432_v38 }
  0xdb   : > { %v525_v43 = vpop.permute.xlu0 %524 }
  0xdc   : > { %v439_v47 = vadd.f32 %v437_v49, %v409_v54  ;;  %v440_v62 = vadd.f32 %v438_v50, %v410_v55 }
  0xde   : > { %v444_v16 = vpop.permute.xlu1 %443 }
  0xdf   : > { %v446_v32 = vsel %vm445_vm5, %v442_v28, %v444_v16  ;;  %v447_v35 = vsel %vm445_vm5, %v444_v16, %v442_v28  ;;  %v502_v63 = vpop.permute.xlu0 %501 }
  0xe0   : > { %v461_v3 = vmul.f32 %v454_v14, %v446_v32  ;;  %v462_v44 = vmul.f32 %v458_v29, %v447_v35 }
  0xe2   : > { %v472_v40 = vpop.permute.xlu1 %471  ;;  %v467_v58 = vmul.f32 %v1068_v39, %v461_v3  ;;  %v468_v59 = vmul.f32 %v1068_v39, %v462_v44 }
  0xe3   : > { %v535_v12 = vpop.permute.xlu0 %534 }
  0xe4   : > { %v469_v7 = vadd.f32 %v467_v58, %v439_v47  ;;  %v470_v8 = vadd.f32 %v468_v59, %v440_v62 }
  0xe6   : > { %v474_v51 = vpop.permute.xlu1 %473 }
  0xe7   : > { %v476_v56 = vsel %vm475_vm6, %v472_v40, %v474_v51  ;;  %v477_v57 = vsel %vm475_vm6, %v474_v51, %v472_v40 }
  0xe8   : > { %v491_v60 = vmul.f32 %v484_v45, %v476_v56  ;;  %v492_v61 = vmul.f32 %v488_v46, %v477_v57 }
  0xea   : > { %v497_v33 = vmul.f32 %v495_v6, %v491_v60  ;;  %v498_v0 = vmul.f32 %v495_v6, %v492_v61  ;;  %v504_v34 = vpop.permute.xlu1 %503 }
  0xeb   : > { %v506_v1 = vsel %vm505_vm7, %v502_v63, %v504_v34  ;;  %v507_v2 = vsel %vm505_vm7, %v504_v34, %v502_v63 }
  0xec   : > { %v521_v4 = vmul.f32 %v514_v52, %v506_v1  ;;  %v522_v5 = vmul.f32 %v518_v53, %v507_v2  ;;  %v499_v9 = vadd.f32 %v497_v33, %v469_v7  ;;  %v500_v39 = vadd.f32 %v498_v0, %v470_v8 }
  0xee   : > { %v527_v10 = vmul.f32 %v525_v43, %v521_v4  ;;  %v528_v11 = vmul.f32 %v525_v43, %v522_v5  ;;  %v548_v15 = vpop.permute.xlu1 %547 }
  0xf0   : > { %v529_v13 = vadd.f32 %v527_v10, %v499_v9  ;;  %v530_v18 = vadd.f32 %v528_v11, %v500_v39 }
  0xf2   : > { %v537_v6 = vadd.f32 %v535_v12, %v529_v13  ;;  %v538_v17 = vadd.f32 %v535_v12, %v530_v18 }
  0xf4   : > { %v539_v19 = vmax.f32 %v537_v6, 0.0  ;;  %v540_v20 = vmax.f32 %v538_v17, 0.0 }
  0xf6   : > { %v542_v26 = vpack.c.bf16 %v539_v19, %v539_v19  ;;  %v543_v21 = vpack.c.bf16 %v540_v20, %v540_v20 }
  0xf8   : > { %699 = vmatprep.subr.msk.bf16.mxu0 %vm554_vm8, %v543_v21  ;;  %v556_v16 = vsel %vm554_vm8, %v542_v26, 0 }
  0xf9   : > { %562 = vmatpush1.bf16.msra.mxu0 %v556_v16 }
  0xfc   : > { %700 = vmatmul.mubr.msk.bf16.vlgmr.msra.gmra.mrb[0].mxu0 %vm550_vm9, %v541_v23 }
 0x1cf   : > { %v595_v24 = vpop.f32.mrb[0].mxu0 }
 0x1d0   : > { %v596_v25 = vadd.f32 %v595_v24, %v548_v15  ;;  %v597_v27 = vpop.f32.mrb[1].mxu0 }
 0x1d1   : > { %v598_v28 = vadd.f32 %v597_v27, %v548_v15  ;;  %v599_v14 = vpop.f32.mrb[2].mxu0 }
 0x1d2   : > { %602 = vst [vmem:[%s260_s19] sm:$0xff] %v596_v25  ;;  %v600_v29 = vpop.f32.mrb[3].mxu0 }
 0x1d3   : > { %603 = vst [vmem:[%s260_s19 + $0x8] sm:$0xff] %v598_v28 }
 0x1d4   : > { %830 = shalt.err (!%p827_p7)
}
 0x1d5   : > { %s831_s14 = scalar_lea.hbm %s1120_s29, 256  ;;  %s835_s16 = scalar_lea.hbm %s1168_s6, 512 }
 0x1d6   : > { %p832_p8 = scmp.ne.s32.totalorder %s1120_s29, %s831_s14  ;;  %p836_p1 = scmp.lt.u32.totalorder %s1120_s29, %s1168_s6 }
 0x1d7   : > { %p837_p0 = scmp.lt.u32.totalorder %s835_s16, %s831_s14  ;;  %p839_p6 = scmp.lt.u32.totalorder %s831_s14, %s1120_s29 }
 0x1d8   : > { %p833_p11 = pnand %p832_p8, %p1179_p9 }
 0x1d9   : > { %p838_p5 = por %p837_p0, %p836_p1 }
 0x1da   : > { %p834_p13 = pneg %p833_p11 }
 0x1db   : > { %p840_p10 = por %p839_p6, %p838_p5 }
 0x1dd   : > { %p841_p12 = pnand %p840_p10, %p834_p13 }
 0x1df   : > { %844 = shalt.err (!%p841_p12)
}
 0x1e0   : > { %711 = dma.vmem_to_hbm [thread:$0]  (%p1179_p9), %s1122_s20, 256, %s1120_s29, %s605_s25  }
 0x1e1 PF: > { %p723_p2 = scmp.ge.s32.totalorder %s883_s24, 2  ;;  %s631_s19 = sand.u32 1, %s871_s21  }
 0x1e2   : > { %p1180_p3 = scmp.ne.s32.totalorder %s1173_s8, 0  ;;  %s632_s26 = scalar_lea.sflag [#allocation4], %s631_s19 }
 0x1e4   : > { %p718_p4 = pnand %p723_p2, %p1180_p3 }
 0x1e6   : > { %866 = dma.done.wait (!%p718_p4), %s632_s26, 256  }
 0x1e7   : > { %868 = vsyncadd (!%p718_p4), %s632_s26, 4294967040  ;;  %p17_p7 = scmp.ge.s32.totalorder %s967_s27, 4   ;;  %s1181_s21 = smov %s875_s22 }
 0x1e8   : > { %s1182_s22 = smov %s879_s23  ;;  %s1183_s23 = smov %s978_s30 }
 0x1e9   : > { %s1184_s24 = smov %s967_s27  ;;  %19 = sbr.rel (!%p17_p7) target bundleno = 4 (0x4), region = 91 }
 0x1f0   :  { %637 = vsyncpa [#allocation3], 1 }
 0x1f1   :  { %639 = vsyncpa [#allocation3 + $0x1], 1 }
 0x1f2   :  { %640 = vsyncpa [#allocation4], 1 }
 0x1f3   :  { %642 = vsyncpa [#allocation4 + $0x1], 1 }

// kernel: tpu_custom_call.1
= control target key start
LH: loop header
LB: loop body
LE: loop exit
PB: predicated region body
PF: predicated region fallthrough
CT: control target
= control target key end

     0   :  { %11 = vsyncpa [#allocation3], 0  ;;  %s1162_s0 = inlined_call_operand.vmem [shape: f32[4,512], index: 0, kind: input, shape index: {}]   ;;  %s1163_s1 = inlined_call_operand.hbm [shape: f32[9,256], index: 1, kind: input, shape index: {}]   ;;  %s1164_s2 = inlined_call_operand.vmem [shape: f32[4,9], index: 2, kind: input, shape index: {}]   ;;  %s1165_s3 = inlined_call_operand.vmem [shape: f32[4,1], index: 3, kind: input, shape index: {}]   ;;  %s1166_s4 = inlined_call_operand.vmem [shape: bf16[8,4], index: 4, kind: input, shape index: {}]   ;;  %s1167_s5 = inlined_call_operand.vmem [shape: f32[8,1], index: 5, kind: input, shape index: {}]   ;;  %s1168_s6 = inlined_call_operand.hbm [shape: f32[8,512], index: 6, kind: output, shape index: {}]  }
   0x1   :  { %12 = vsyncpa [#allocation4], 0 }
   0x2   :  { %14 = vsyncpa [#allocation4 + $0x1], 0  ;;  %s942_s21 = smov 0   ;;  %s944_s22 = smov 0  }
   0x3   :  { %s946_s23 = smov 0   ;;  %s948_s24 = smov 0  }
   0x4 LB: > { %s963_s25 = sadd.s32 4294967295, %s883_s24   ;;  %s690_s26 = sadd.s32 4294967294, %s883_s24   ;;  %s883_s24 = sphi %s948_s24, %s1184_s24   ;;  %s879_s23 = sphi %s946_s23, %s1183_s23   ;;  %s875_s22 = sphi %s944_s22, %s1182_s22   ;;  %s871_s21 = sphi %s942_s21, %s1181_s21  }
   0x5   : > { %s967_s27 = sadd.s32 1, %s883_s24   ;;  %s158_s28 = sadd.s32 1, %s879_s23 }
   0x6   : > { %s155_s29 = ssub.s32 %s883_s24, %s967_s27  ;;  %p168_p0 = scmp.ne.s32.totalorder %s879_s23, %s875_s22 }
   0x7   : > { %p156_p1 = scmp.eq.s32.totalorder %s155_s29, 0  ;;  %p169_p2 = scmp.eq.s32.totalorder %s963_s25, 1 }
   0x8   : > { %p174_p3 = scmp.ne.s32.totalorder %s875_s22, %s871_s21  ;;  %p175_p4 = scmp.eq.s32.totalorder %s690_s26, 1 }
   0x9   : > { %s978_s30 = scalar_select %p156_p1, %s879_s23, %s158_s28  }
   0xa   : > { %p980_p5 = por %p169_p2, %p168_p0  ;;  %p984_p6 = por %p175_p4, %p174_p3 }
   0xb   : > { %p691_p7 = scmp.ge.s32.totalorder %s883_s24, 1  ;;  %p182_p8 = scmp.lt.s32.totalorder %s883_s24, 3 }
   0xc   : > { %s1172_s7 = scalar_select %p980_p5, 1, 0 }
   0xd   : > { %s1173_s8 = scalar_select %p984_p6, 1, 0 }
   0xe   : > { %p1169_p9 = scmp.eq.s32.totalorder %s963_s25, 0  ;;  %p991_p10 = pnand %p691_p7, %p182_p8 }
   0xf   : > { %s885_s10 = smov [#allocation2]   ;;  %s789_s15 = scalar_lea.hbm %s1163_s1, 512 }
  0x10   : > { %s1174_s9 = scalar_select %p991_p10, 1, 0 }
  0x11   : > { %s194_s11 = sshll.u32 %s885_s10, 4  ;;  %p713_p11 = pneg %p991_p10  ;;  %s195_s11 = int_to_ptr.vmem [resolvable:$true] %s194_s11 }
  0x12   : > { %p790_p13 = scmp.ne.s32.totalorder %s1163_s1, %s789_s15  ;;  %p796_p3 = scmp.lt.u32.totalorder %s789_s15, %s1163_s1 }
  0x13   : > { %p999_p12 = pnand %p1169_p9, %p713_p11 }
  0x15   : > { %p791_p0 = pneg %p999_p12 }
  0x17   : > { %p792_p1 = pnand %p791_p0, %p790_p13 }
  0x19   : > { %p793_p2 = pneg %p792_p1 }
  0x1b   : > { %p798_p4 = pnand %p796_p3, %p793_p2 }
  0x1d   : > { %801 = shalt.err (!%p798_p4)
}
  0x1e   : > { %s802_s20 = scalar_lea.vmem %s195_s11, 512  ;;  %p810_p9 = scmp.lt.s32.totalorder %s195_s11, %s195_s11 }
  0x1f   : > { %p803_p7 = scmp.ne.s32.totalorder %s195_s11, %s802_s20  ;;  %p811_p6 = scmp.lt.s32.totalorder %s802_s20, %s802_s20 }
  0x21   : > { %p805_p8 = pnand %p803_p7, %p791_p0  ;;  %p812_p5 = por %p811_p6, %p810_p9 }
  0x23   : > { %p806_p11 = pneg %p805_p8 }
  0x25   : > { %p813_p10 = pnand %p812_p5, %p806_p11 }
  0x27   : > { %816 = shalt.err (!%p813_p10)
}
  0x28   : > { %s886_s26 = smov 256   ;;  %s887_s28 = smov 16  }
  0x29   : > { %716 = dma.hbm_to_vmem [thread:$0]  (!%p999_p12), %s1163_s1, 512, %s195_s11, [#allocation3], %s886_s26, %s886_s26, %s887_s28  }
  0x2a   : > { %p1176_p13 = scmp.ne.s32.totalorder %s1174_s9, 0 }
  0x2b   : > { %p1177_p1 = scmp.eq.s32.totalorder (!%p1176_p13), %s963_s25, 0 }
  0x2c   : > { %231 = sbr.rel (%p1176_p13) target bundleno = 481 (0x1e1), region = 44 }
  0x33   : > { %862 = dma.done.wait (%p1177_p1), [#allocation3], 512   ;;  %p1178_p0 = pmov %p1177_p1 }
  0x34   : > { %v888_v0 = vmov 2   ;;  %v889_v1 = vmov 0   ;;  %s697_s13 = sshll.u32 %s963_s25, 1  ;;  %v270_v2 = vld [vmem:[%s1164_s2] sm:$0xf]  ;;  %v890_v4 = vmov 4   ;;  %v278_v24 = vlaneseq }
  0x35   : > { %864 = vsyncadd (%p1178_p0), [#allocation3], 4294966784  ;;  %779 = vset.pattern.permute.xlu1 %v888_v0  ;;  %777 = vset.pattern.permute.xlu0 %v889_v1  ;;  %p262_p5 = scmp.lt.s32.totalorder %s697_s13, 3  ;;  %v891_v5 = vmov 1   ;;  %s892_s17 = smov 17   ;;  %v893_v7 = vmov 3  }
  0x36   : > { %593 = vmatprep.mubr.bf16.mxu0 %v889_v1  ;;  %357 = vperm.xlu1 %779, %v270_v2   ;;  %v894_v8 = vmov 5   ;;  %s895_s18 = smov 16   ;;  %s896_s19 = smov 15   ;;  %v898_v9 = vmov 6   ;;  %v900_v10 = vmov 8   ;;  %v902_v11 = vmov 7  }
  0x37   : > { %s1186_s13 = smov (!%p262_p5, %s697_s13), 3  ;;  %299 = vperm.xlu0 %777, %v270_v2   ;;  %s897_s20 = smov 1   ;;  %v531_v12 = vld [vmem:[%s1165_s3] sm:$0xf]  ;;  %v1058_v26 = vand.u32 127, %v278_v24  ;;  %v286_v27 = vshrl.u32 %v278_v24, 7 }
  0x38   : > { %s698_s12 = sshll.u32 %s1186_s13, 2  ;;  %s899_s26 = smov 127   ;;  %v544_v13 = vld [vmem:[%s1167_s5] sm:$0xff]  ;;  %v905_v30 = vmov 839922192   ;;  %vm554_vm8 = vcmask 1041408  }
  0x39   : > { %s265_s16 = scalar_lea.vmem %s1162_s0, %s698_s12  ;;  %s901_s28 = smov 113   ;;  %v398_v31 = vunpack.c.l.s4 %v905_v30  ;;  %v312_v32 = vld [vmem:[#allocation2 + $0x1] ss:$8 sm:$0x3]  ;;  %v1060_v33 = vsub.s32 0, %v286_v27  ;;  %v1062_v34 = vsub.s32 1, %v286_v27 }
  0x3a   : > { %v1032_v3 = vld [vmem:[%s265_s16] sm:$0xff]  ;;  %780 = vset.pattern.permute.xlu1 %v890_v4  ;;  %s903_s29 = smov 111   ;;  %s904_s12 = smov 112   ;;  %vm308_vm0 = vcmp.lt.s32.totalorder %v1058_v26, 16  ;;  %vm280_vm1 = vcmp.lt.s32.totalorder %v1058_v26, 17  ;;  %vm338_vm2 = vcmp.lt.s32.totalorder %v1058_v26, 15 }
  0x3b   : > { %778 = vset.pattern.permute.xlu0 %v891_v5  ;;  %395 = vperm.xlu1 %780, %v270_v2   ;;  %v272_v6 = vcombine.high %v1032_v3, %v1032_v3  ;;  %v283_v35 = vld [vmem:[#allocation2] ss:$8 sm:$0x3]  ;;  %v342_v36 = vld [vmem:[#allocation2 + $0x2] ss:$8 sm:$0x3]  ;;  %v317_v37 = vrot.slane %v312_v32, %v1060_v33  ;;  %v321_v38 = vrot.slane %v312_v32, %v1062_v34  ;;  %v399_v40 = vunpack.c.0.s8 %v398_v31 }
  0x3c   : > { %327 = vperm.xlu0 %778, %v270_v2   ;;  %v288_v43 = vrot.slane %v283_v35, %v1060_v33  ;;  %v292_v44 = vrot.slane %v283_v35, %v1062_v34  ;;  %v347_v45 = vrot.slane %v342_v36, %v1060_v33  ;;  %v372_v46 = vld [vmem:[#allocation2 + $0x3] ss:$8 sm:$0x3]  ;;  %v351_v50 = vrot.slane %v342_v36, %v1062_v34  ;;  %v419_v5 = vld [vmem:[#allocation2 + $0x5] ss:$8 sm:$0x3] }
  0x3d   : > { %vm368_vm3 = vcmp.lt.s32.totalorder %v1058_v26, 1  ;;  %v402_v56 = vsub.s32 %v399_v40, %v286_v27  ;;  %v377_v57 = vrot.slane %v372_v46, %v1060_v33  ;;  %v381_v58 = vrot.slane %v372_v46, %v1062_v34  ;;  %v479_v36 = vld [vmem:[#allocation2 + $0x7] ss:$8 sm:$0x3]  ;;  %s258_s16 = sand.u32 1, %s875_s22   ;;  %p1179_p9 = scmp.ne.s32.totalorder %s1172_s7, 0 }
  0x3e   : > { %vm415_vm4 = vcmp.lt.s32.totalorder %v1058_v26, 127  ;;  %vm445_vm5 = vcmp.lt.s32.totalorder %v1058_v26, 113  ;;  %vm475_vm6 = vcmp.lt.s32.totalorder %v1058_v26, 112  ;;  %v488_v46 = vrot.slane %v479_v36, %v1062_v34  ;;  %s906_s13 = smov [#allocation5]  }
  0x3f   : > { %274 = vrot.lane.b32.xlu1 %v1032_v3, %s892_s17  ;;  %vm505_vm7 = vcmp.lt.s32.totalorder %v1058_v26, 111  ;;  %vm550_vm9 = vcmask 31744  }
  0x40   : > { %276 = vrot.lane.b32.xlu0 %v272_v6, %s892_s17  ;;  %781 = vset.pattern.permute.xlu1 %v893_v7  ;;  %s696_s17 = sshll.u32 %s258_s16, 4 }
  0x41   : > { %782 = vset.pattern.permute.xlu0 %v894_v8 }
  0x43   : > { %304 = vrot.lane.b32.xlu1 %v1032_v3, %s895_s18 }
  0x44   : > { %306 = vrot.lane.b32.xlu0 %v272_v6, %s895_s18  ;;  %s706_s18 = sshll.u32 %s963_s25, 8  ;;  %s605_s25 = scalar_lea.sflag [#allocation4], %s258_s16 }
  0x47   : > { %387 = vperm.xlu1 %781, %v270_v2  }
  0x48   : > { %334 = vrot.lane.b32.xlu0 %v1032_v3, %s896_s19 }
  0x4b   : > { %336 = vrot.lane.b32.xlu1 %v272_v6, %s896_s19  ;;  %s260_s19 = scalar_lea.vmem [#allocation5], %s696_s17 }
  0x4c   : > { %364 = vrot.lane.b32.xlu0 %v1032_v3, %s897_s20  ;;  %783 = vset.pattern.permute.xlu1 %v898_v9 }
  0x4f   : > { %366 = vrot.lane.b32.xlu1 %v272_v6, %s897_s20  ;;  %s619_s20 = sshll.u32 %s260_s19, 4  ;;  %s1122_s20 = int_to_ptr.vmem [resolvable:$true] %s619_s20 }
  0x50   : > { %434 = vperm.xlu0 %782, %v270_v2   ;;  %s817_s10 = scalar_lea.vmem %s1122_s20, 256 }
  0x51   : > { %p818_p6 = scmp.ne.s32.totalorder %s1122_s20, %s817_s10 }
  0x53   : > { %464 = vperm.xlu1 %783, %v270_v2   ;;  %p819_p10 = pnand %p818_p6, %p1179_p9 }
  0x54   : > { %413 = vrot.lane.b32.xlu0 %v272_v6, %s899_s26 }
  0x55   : > { %785 = vset.pattern.permute.xlu0 %v900_v10  ;;  %p820_p12 = pneg %p819_p10 }
  0x57   : > { %411 = vrot.lane.b32.xlu1 %v1032_v3, %s899_s26 }
  0x58   : > { %441 = vrot.lane.b32.xlu0 %v1032_v3, %s901_s28  ;;  %784 = vset.pattern.permute.xlu1 %v902_v11 }
  0x5b   : > { %494 = vperm.xlu1 %784, %v270_v2  }
  0x5c   : > { %524 = vperm.xlu0 %785, %v270_v2  }
  0x5f   : > { %443 = vrot.lane.b32.xlu1 %v272_v6, %s901_s28 }
  0x60   : > { %501 = vrot.lane.b32.xlu0 %v1032_v3, %s903_s29  ;;  %787 = vset.pattern.permute.xlu1 %v889_v1 }
  0x61   : > { %786 = vset.pattern.permute.xlu0 %v889_v1 }
  0x63   : > { %471 = vrot.lane.b32.xlu1 %v1032_v3, %s904_s12 }
  0x64   : > { %534 = vperm.xlu0 %786, %v531_v12  }
  0x67   : > { %473 = vrot.lane.b32.xlu1 %v272_v6, %s904_s12  ;;  %s821_s12 = sshll.u32 %s906_s13, 4  ;;  %s822_s12 = int_to_ptr.vmem [resolvable:$false] %s821_s12 }
  0x68   : > { %s823_s11 = scalar_lea.vmem %s822_s12, 512  ;;  %p824_p2 = scmp.lt.s32.totalorder %s1122_s20, %s822_s12 }
  0x69   : > { %p825_p3 = scmp.lt.s32.totalorder %s823_s11, %s817_s10 }
  0x6b   : > { %503 = vrot.lane.b32.xlu1 %v272_v6, %s903_s29  ;;  %s1120_s29 = scalar_lea.hbm %s1168_s6, %s706_s18  ;;  %p826_p4 = por %p825_p3, %p824_p2 }
  0x6d   : > { %p827_p7 = pnand %p826_p4, %p820_p12 }
  0x6f   : > { %547 = vperm.xlu1 %787, %v544_v13  }
  0xb5   : > { %v1050_v14 = vpop.permute.xlu1 %357 }
  0xb6   : > { %v1052_v15 = vpop.permute.xlu0 %299 }
  0xba   : > { %v1054_v16 = vpop.permute.xlu1 %395 }
  0xbb   : > { %v328_v17 = vpop.permute.xlu0 %327  ;;  %v403_v9 = vrot.slane %v1054_v16, %v402_v56 }
  0xbd   : > { %v405_v27 = vmul.f32 %v403_v9, %v1032_v3 }
  0xbe   : > { %v275_v18 = vpop.permute.xlu1 %274 }
  0xbf   : > { %v277_v19 = vpop.permute.xlu0 %276 }
  0xc0   : > { %v281_v48 = vsel %vm280_vm1, %v275_v18, %v277_v19  ;;  %v282_v49 = vsel %vm280_vm1, %v277_v19, %v275_v18  ;;  %v424_v18 = vrot.slane %v419_v5, %v1060_v33 }
  0xc1   : > { %v295_v59 = vmul.f32 %v288_v43, %v282_v49  ;;  %v296_v60 = vmul.f32 %v292_v44, %v281_v48  ;;  %v407_v48 = vcombine.high %v405_v27, %v405_v27 }
  0xc2   : > { %v305_v20 = vpop.permute.xlu1 %304 }
  0xc3   : > { %v307_v21 = vpop.permute.xlu0 %306  ;;  %v302_v10 = vmul.f32 %v1052_v15, %v295_v59  ;;  %v303_v11 = vmul.f32 %v1052_v15, %v296_v60 }
  0xc4   : > { %v309_v41 = vsel %vm308_vm0, %v305_v20, %v307_v21  ;;  %v310_v42 = vsel %vm308_vm0, %v307_v21, %v305_v20  ;;  %v428_v21 = vrot.slane %v419_v5, %v1062_v34 }
  0xc5   : > { %v324_v51 = vmul.f32 %v317_v37, %v310_v42  ;;  %v325_v52 = vmul.f32 %v321_v38, %v309_v41 }
  0xc6   : > { %v1056_v22 = vpop.permute.xlu1 %387 }
  0xc7   : > { %v335_v23 = vpop.permute.xlu0 %334  ;;  %v330_v1 = vmul.f32 %v328_v17, %v324_v51  ;;  %v331_v2 = vmul.f32 %v328_v17, %v325_v52  ;;  %v449_v17 = vld [vmem:[#allocation2 + $0x6] ss:$8 sm:$0x3] }
  0xc9   : > { %v332_v19 = vadd.f32 %v330_v1, %v302_v10  ;;  %v333_v20 = vadd.f32 %v331_v2, %v303_v11 }
  0xca   : > { %v337_v25 = vpop.permute.xlu1 %336 }
  0xcb   : > { %v365_v28 = vpop.permute.xlu0 %364  ;;  %v339_v53 = vsel %vm338_vm2, %v335_v23, %v337_v25  ;;  %v340_v54 = vsel %vm338_vm2, %v337_v25, %v335_v23 }
  0xcc   : > { %v354_v63 = vmul.f32 %v347_v45, %v340_v54  ;;  %v355_v0 = vmul.f32 %v351_v50, %v339_v53  ;;  %v484_v45 = vrot.slane %v479_v36, %v1060_v33 }
  0xce   : > { %v367_v29 = vpop.permute.xlu1 %366  ;;  %v360_v12 = vmul.f32 %v1050_v14, %v354_v63  ;;  %v361_v13 = vmul.f32 %v1050_v14, %v355_v0  ;;  %v454_v14 = vrot.slane %v449_v17, %v1060_v33 }
  0xcf   : > { %v1074_v47 = vpop.permute.xlu0 %434  ;;  %v369_v61 = vsel %vm368_vm3, %v365_v28, %v367_v29  ;;  %v370_v62 = vsel %vm368_vm3, %v367_v29, %v365_v28  ;;  %v458_v29 = vrot.slane %v449_v17, %v1062_v34 }
  0xd0   : > { %v384_v7 = vmul.f32 %v377_v57, %v370_v62  ;;  %v385_v8 = vmul.f32 %v381_v58, %v369_v61  ;;  %v362_v30 = vadd.f32 %v360_v12, %v332_v19  ;;  %v363_v31 = vadd.f32 %v361_v13, %v333_v20 }
  0xd2   : > { %v1068_v39 = vpop.permute.xlu1 %464  ;;  %v390_v23 = vmul.f32 %v1056_v22, %v384_v7  ;;  %v391_v15 = vmul.f32 %v1056_v22, %v385_v8  ;;  %v509_v22 = vld [vmem:[#allocation2 + $0x10] ss:$8 sm:$0x3] }
  0xd3   : > { %v414_v4 = vpop.permute.xlu0 %413  ;;  %v514_v52 = vrot.slane %v509_v22, %v1060_v33  ;;  %v518_v53 = vrot.slane %v509_v22, %v1062_v34 }
  0xd4   : > { %v392_v41 = vadd.f32 %v390_v23, %v362_v30  ;;  %v393_v42 = vadd.f32 %v391_v15, %v363_v31  ;;  %v541_v23 = vld [vmem:[%s1166_s4] sm:$0xf] }
  0xd6   : > { %v412_v55 = vpop.permute.xlu1 %411  ;;  %v409_v54 = vadd.f32 %v405_v27, %v392_v41 }
  0xd7   : > { %v416_v24 = vsel %vm415_vm4, %v412_v55, %v414_v4  ;;  %v417_v25 = vsel %vm415_vm4, %v414_v4, %v412_v55  ;;  %v442_v28 = vpop.permute.xlu0 %441  ;;  %v410_v55 = vadd.f32 %v407_v48, %v393_v42 }
  0xd8   : > { %v431_v37 = vmul.f32 %v424_v18, %v416_v24  ;;  %v432_v38 = vmul.f32 %v428_v21, %v417_v25 }
  0xda   : > { %v495_v6 = vpop.permute.xlu1 %494  ;;  %v437_v49 = vmul.f32 %v1074_v47, %v431_v37  ;;  %v438_v50 = vmul.f32 %v1074_v47, %v432_v38 }
  0xdb   : > { %v525_v43 = vpop.permute.xlu0 %524 }
  0xdc   : > { %v439_v47 = vadd.f32 %v437_v49, %v409_v54  ;;  %v440_v62 = vadd.f32 %v438_v50, %v410_v55 }
  0xde   : > { %v444_v16 = vpop.permute.xlu1 %443 }
  0xdf   : > { %v446_v32 = vsel %vm445_vm5, %v442_v28, %v444_v16  ;;  %v447_v35 = vsel %vm445_vm5, %v444_v16, %v442_v28  ;;  %v502_v63 = vpop.permute.xlu0 %501 }
  0xe0   : > { %v461_v3 = vmul.f32 %v454_v14, %v446_v32  ;;  %v462_v44 = vmul.f32 %v458_v29, %v447_v35 }
  0xe2   : > { %v472_v40 = vpop.permute.xlu1 %471  ;;  %v467_v58 = vmul.f32 %v1068_v39, %v461_v3  ;;  %v468_v59 = vmul.f32 %v1068_v39, %v462_v44 }
  0xe3   : > { %v535_v12 = vpop.permute.xlu0 %534 }
  0xe4   : > { %v469_v7 = vadd.f32 %v467_v58, %v439_v47  ;;  %v470_v8 = vadd.f32 %v468_v59, %v440_v62 }
  0xe6   : > { %v474_v51 = vpop.permute.xlu1 %473 }
  0xe7   : > { %v476_v56 = vsel %vm475_vm6, %v472_v40, %v474_v51  ;;  %v477_v57 = vsel %vm475_vm6, %v474_v51, %v472_v40 }
  0xe8   : > { %v491_v60 = vmul.f32 %v484_v45, %v476_v56  ;;  %v492_v61 = vmul.f32 %v488_v46, %v477_v57 }
  0xea   : > { %v497_v33 = vmul.f32 %v495_v6, %v491_v60  ;;  %v498_v0 = vmul.f32 %v495_v6, %v492_v61  ;;  %v504_v34 = vpop.permute.xlu1 %503 }
  0xeb   : > { %v506_v1 = vsel %vm505_vm7, %v502_v63, %v504_v34  ;;  %v507_v2 = vsel %vm505_vm7, %v504_v34, %v502_v63 }
  0xec   : > { %v521_v4 = vmul.f32 %v514_v52, %v506_v1  ;;  %v522_v5 = vmul.f32 %v518_v53, %v507_v2  ;;  %v499_v9 = vadd.f32 %v497_v33, %v469_v7  ;;  %v500_v39 = vadd.f32 %v498_v0, %v470_v8 }
  0xee   : > { %v527_v10 = vmul.f32 %v525_v43, %v521_v4  ;;  %v528_v11 = vmul.f32 %v525_v43, %v522_v5  ;;  %v548_v15 = vpop.permute.xlu1 %547 }
  0xf0   : > { %v529_v13 = vadd.f32 %v527_v10, %v499_v9  ;;  %v530_v18 = vadd.f32 %v528_v11, %v500_v39 }
  0xf2   : > { %v537_v6 = vadd.f32 %v535_v12, %v529_v13  ;;  %v538_v17 = vadd.f32 %v535_v12, %v530_v18 }
  0xf4   : > { %v539_v19 = vmax.f32 %v537_v6, 0.0  ;;  %v540_v20 = vmax.f32 %v538_v17, 0.0 }
  0xf6   : > { %v542_v26 = vpack.c.bf16 %v539_v19, %v539_v19  ;;  %v543_v21 = vpack.c.bf16 %v540_v20, %v540_v20 }
  0xf8   : > { %699 = vmatprep.subr.msk.bf16.mxu0 %vm554_vm8, %v543_v21  ;;  %v556_v16 = vsel %vm554_vm8, %v542_v26, 0 }
  0xf9   : > { %562 = vmatpush1.bf16.msra.mxu0 %v556_v16 }
  0xfc   : > { %700 = vmatmul.mubr.msk.bf16.vlgmr.msra.gmra.mrb[0].mxu0 %vm550_vm9, %v541_v23 }
 0x1cf   : > { %v595_v24 = vpop.f32.mrb[0].mxu0 }
 0x1d0   : > { %v596_v25 = vadd.f32 %v595_v24, %v548_v15  ;;  %v597_v27 = vpop.f32.mrb[1].mxu0 }
 0x1d1   : > { %v598_v28 = vadd.f32 %v597_v27, %v548_v15  ;;  %v599_v14 = vpop.f32.mrb[2].mxu0 }
 0x1d2   : > { %602 = vst [vmem:[%s260_s19] sm:$0xff] %v596_v25  ;;  %v600_v29 = vpop.f32.mrb[3].mxu0 }
 0x1d3   : > { %603 = vst [vmem:[%s260_s19 + $0x8] sm:$0xff] %v598_v28 }
 0x1d4   : > { %830 = shalt.err (!%p827_p7)
}
 0x1d5   : > { %s831_s14 = scalar_lea.hbm %s1120_s29, 256  ;;  %s835_s16 = scalar_lea.hbm %s1168_s6, 512 }
 0x1d6   : > { %p832_p8 = scmp.ne.s32.totalorder %s1120_s29, %s831_s14  ;;  %p836_p1 = scmp.lt.u32.totalorder %s1120_s29, %s1168_s6 }
 0x1d7   : > { %p837_p0 = scmp.lt.u32.totalorder %s835_s16, %s831_s14  ;;  %p839_p6 = scmp.lt.u32.totalorder %s831_s14, %s1120_s29 }
 0x1d8   : > { %p833_p11 = pnand %p832_p8, %p1179_p9 }
 0x1d9   : > { %p838_p5 = por %p837_p0, %p836_p1 }
 0x1da   : > { %p834_p13 = pneg %p833_p11 }
 0x1db   : > { %p840_p10 = por %p839_p6, %p838_p5 }
 0x1dd   : > { %p841_p12 = pnand %p840_p10, %p834_p13 }
 0x1df   : > { %844 = shalt.err (!%p841_p12)
}
 0x1e0   : > { %711 = dma.vmem_to_hbm [thread:$0]  (%p1179_p9), %s1122_s20, 256, %s1120_s29, %s605_s25  }
 0x1e1 PF: > { %p723_p2 = scmp.ge.s32.totalorder %s883_s24, 2  ;;  %s631_s19 = sand.u32 1, %s871_s21  }
 0x1e2   : > { %p1180_p3 = scmp.ne.s32.totalorder %s1173_s8, 0  ;;  %s632_s26 = scalar_lea.sflag [#allocation4], %s631_s19 }
 0x1e4   : > { %p718_p4 = pnand %p723_p2, %p1180_p3 }
 0x1e6   : > { %866 = dma.done.wait (!%p718_p4), %s632_s26, 256  }
 0x1e7   : > { %868 = vsyncadd (!%p718_p4), %s632_s26, 4294967040  ;;  %p17_p7 = scmp.ge.s32.totalorder %s967_s27, 4   ;;  %s1181_s21 = smov %s875_s22 }
 0x1e8   : > { %s1182_s22 = smov %s879_s23  ;;  %s1183_s23 = smov %s978_s30 }
 0x1e9   : > { %s1184_s24 = smov %s967_s27  ;;  %19 = sbr.rel (!%p17_p7) target bundleno = 4 (0x4), region = 91 }
 0x1f0   :  { %637 = vsyncpa [#allocation3], 1 }
 0x1f1   :  { %639 = vsyncpa [#allocation3 + $0x1], 1 }
 0x1f2   :  { %640 = vsyncpa [#allocation4], 1 }
 0x1f3   :  { %642 = vsyncpa [#allocation4 + $0x1], 1 }

</bundles_post_ra>
